<compile_context>
chip_gen: v7x
topology: tpu7x:2x2x1
jax: 0.10.0
libtpu: 0.0.40
codegen_flags: <defaults>
</compile_context>

<pallas_src>
import math

import jax
import jax.numpy as jnp
from jax.experimental import pallas as pl
from jax.experimental.pallas import tpu as pltpu


def _round_up(x, m):
    return (x + m - 1) // m * m


# ----------------------------------------------------------------------------
# Pallas kernel: fused 1x1 conv (matmul) + bias + ReLU
# ----------------------------------------------------------------------------
def _conv1x1_bias_relu_kernel(w_ref, b_ref, x_ref, o_ref):
    # bf16 operands -> MXU fast path; accumulate in f32.
    w = w_ref[...].astype(jnp.bfloat16)
    x = x_ref[...].astype(jnp.bfloat16)
    y = jnp.dot(w, x, preferred_element_type=jnp.float32)
    y = y + b_ref[...]                      # (Cout, 1) broadcasts across lanes
    o_ref[...] = jnp.maximum(y, 0.0).astype(o_ref.dtype)


def conv1x1_relu(x_nchw, w, b, *, tile_n=256):
    """x: (N, Cin, H, W).  w: (Cout, Cin, 1, 1) PyTorch layout.  b: (Cout,).

    Returns relu(conv1x1(x) + b) in NCHW, float32.
    """
    N, Cin, H, W = x_nchw.shape
    Cout = w.shape[0]
    M = N * H * W

    # (Cin, N*H*W): channels on sublanes (contraction dim), pixels on lanes.
    x2 = jnp.transpose(x_nchw, (1, 0, 2, 3)).reshape(Cin, M).astype(jnp.float32)
    wmat = w.reshape(Cout, Cin).astype(jnp.float32)
    b2 = b.reshape(Cout, 1).astype(jnp.float32)

    tn = min(tile_n, _round_up(M, 128))     # lane-dense pixel tile
    Mpad = _round_up(M, tn)
    if Mpad != M:
        x2 = jnp.pad(x2, ((0, 0), (0, Mpad - M)))
    grid = (Mpad // tn,)

    out = pl.pallas_call(
        _conv1x1_bias_relu_kernel,
        out_shape=jax.ShapeDtypeStruct((Cout, Mpad), jnp.float32),
        grid=grid,
        in_specs=[
            pl.BlockSpec((Cout, Cin), lambda j: (0, 0)),   # weight, resident
            pl.BlockSpec((Cout, 1), lambda j: (0, 0)),     # bias, resident
            pl.BlockSpec((Cin, tn), lambda j: (0, j)),     # pixel tile
        ],
        out_specs=pl.BlockSpec((Cout, tn), lambda j: (0, j)),
        compiler_params=pltpu.CompilerParams(
            dimension_semantics=("parallel",),             # shard across TCs
            vmem_limit_bytes=48 * 1024 * 1024,             # fits v7x (64 MiB)
        ),
    )(wmat, b2, x2)

    out = out[:, :M].reshape(Cout, N, H, W)
    return jnp.transpose(out, (1, 0, 2, 3))                # back to NCHW


# ----------------------------------------------------------------------------
# PixelShuffle(2): pure layout permutation (no compute) -> plain JAX glue.
# ----------------------------------------------------------------------------
def pixel_shuffle_nchw(x, r):
    """torch.nn.PixelShuffle(r): (N, C, H, W) -> (N, C//r^2, H*r, W*r)."""
    N, C, H, W = x.shape
    Co = C // (r * r)
    x = x.reshape(N, Co, r, r, H, W)
    x = jnp.transpose(x, (0, 1, 4, 2, 5, 3))
    return x.reshape(N, Co, H * r, W * r)


def up_pixel_forward(x, w, b):
    """_up_piexl.forward: pixel_shuffle(relu(conv1x1(x) + b), 2)."""
    y = conv1x1_relu(x, w, b)
    return pixel_shuffle_nchw(y, 2)


# ----------------------------------------------------------------------------
# Pure-JAX reference for the correctness check
# ----------------------------------------------------------------------------
def _ref_forward(x, w, b):
    y = jnp.einsum("oi,nihw->nohw", w[:, :, 0, 0], x) + b[None, :, None, None]
    y = jnp.maximum(y, 0.0)
    return pixel_shuffle_nchw(y, 2)


# ----------------------------------------------------------------------------
if __name__ == "__main__":
    key = jax.random.PRNGKey(0)
    kx, kw, kb = jax.random.split(key, 3)

    # channel_in must be divisible by 4 for PixelShuffle(2); 64 keeps clean
    # (8,128) TPU layouts while staying small.
    N, C, H, W = 2, 64, 16, 16
    x = jax.random.normal(kx, (N, C, H, W), jnp.float32)
    w = jax.random.normal(kw, (C, C, 1, 1), jnp.float32) / math.sqrt(C)
    b = 0.1 * jax.random.normal(kb, (C,), jnp.float32)

    fwd = jax.jit(up_pixel_forward)
    out = fwd(x, w, b)
    jax.block_until_ready(out)

    assert out.shape == (N, C // 4, 2 * H, 2 * W), out.shape

    ref = _ref_forward(x, w, b)
    max_err = float(jnp.max(jnp.abs(out - ref)))
    assert bool(jnp.isfinite(out).all()), "non-finite output"
    assert bool(jnp.allclose(out, ref, rtol=2e-2, atol=2e-2)), max_err

    print("KERNEL_OK")
</pallas_src>

<mosaic_0001>
module attributes {stable_mosaic.version = 11 : i64} {
  func.func @_conv1x1_bias_relu_kernel(%arg0: i32, %arg1: memref<64x64xf32, #tpu.memory_space<vmem>>, %arg2: memref<64x1xf32, #tpu.memory_space<vmem>>, %arg3: memref<64x256xf32, #tpu.memory_space<vmem>>, %arg4: memref<64x256xf32, #tpu.memory_space<vmem>>) attributes {dimension_semantics = [#tpu.dimension_semantics<parallel>], iteration_bounds = array<i64: 2>, scalar_prefetch = 0 : i64, scratch_operands = 0 : i64, tpu.core_type = #tpu.core_type<tc>, window_params = [{pipeline_mode = #tpu.pipeline_mode<synchronous>, transform_indices = @transform_0, window_bounds = array<i64: 64, 64>}, {pipeline_mode = #tpu.pipeline_mode<synchronous>, transform_indices = @transform_1, window_bounds = array<i64: 64, 1>}, {transform_indices = @transform_2, window_bounds = array<i64: 64, 256>}, {transform_indices = @transform_3, window_bounds = array<i64: 64, 256>}]} {
    %c0 = arith.constant 0 : index
    %c0_0 = arith.constant 0 : index
    %0 = vector.load %arg1[%c0, %c0_0] : memref<64x64xf32, #tpu.memory_space<vmem>>, vector<64x64xf32>
    %1 = arith.truncf %0 : vector<64x64xf32> to vector<64x64xbf16>
    %c0_1 = arith.constant 0 : index
    %c0_2 = arith.constant 0 : index
    %2 = vector.load %arg3[%c0_1, %c0_2] : memref<64x256xf32, #tpu.memory_space<vmem>>, vector<64x256xf32>
    %3 = arith.truncf %2 : vector<64x256xf32> to vector<64x256xbf16>
    %cst = arith.constant dense<0.000000e+00> : vector<64x256xf32>
    %4 = tpu.matmul %1, %3, %cst {dimension_numbers = #tpu.dot_dimension_numbers<[1], [0], [0], [1], [0, 0, 1, 1], [], []>} : vector<64x64xbf16>, vector<64x256xbf16>, vector<64x256xf32> -> vector<64x256xf32>
    %c0_3 = arith.constant 0 : index
    %c0_4 = arith.constant 0 : index
    %5 = vector.load %arg2[%c0_3, %c0_4] : memref<64x1xf32, #tpu.memory_space<vmem>>, vector<64x1xf32>
    %6 = vector.broadcast %5 : vector<64x1xf32> to vector<64x256xf32>
    %7 = arith.addf %4, %6 : vector<64x256xf32>
    %cst_5 = arith.constant 0.000000e+00 : f32
    %8 = vector.broadcast %cst_5 : f32 to vector<64x256xf32>
    %9 = arith.maximumf %7, %8 : vector<64x256xf32>
    %c0_6 = arith.constant 0 : index
    %c0_7 = arith.constant 0 : index
    %10 = vector.load %arg4[%c0_6, %c0_7] : memref<64x256xf32, #tpu.memory_space<vmem>>, vector<64x256xf32>
    tpu.vector_store %arg4[%c0_6, %c0_7], %9 {strides = array<i32>} : memref<64x256xf32, #tpu.memory_space<vmem>>, vector<64x256xf32>,
    return
  }
  func.func @transform_0(%arg0: i32) -> (i32, i32) {
    %c0_i32 = arith.constant 0 : i32
    %c0_i32_0 = arith.constant 0 : i32
    %c0_i32_1 = arith.constant 0 : i32
    return %c0_i32, %c0_i32_0 : i32, i32
  }
  func.func @transform_1(%arg0: i32) -> (i32, i32) {
    %c0_i32 = arith.constant 0 : i32
    %c0_i32_0 = arith.constant 0 : i32
    %c0_i32_1 = arith.constant 0 : i32
    return %c0_i32, %c0_i32_0 : i32, i32
  }
  func.func @transform_2(%arg0: i32) -> (i32, i32) {
    %c0_i32 = arith.constant 0 : i32
    %c0_i32_0 = arith.constant 0 : i32
    return %c0_i32, %arg0 : i32, i32
  }
  func.func @transform_3(%arg0: i32) -> (i32, i32) {
    %c0_i32 = arith.constant 0 : i32
    %c0_i32_0 = arith.constant 0 : i32
    return %c0_i32, %arg0 : i32, i32
  }
}

</mosaic_0001>

<bundles_post_ra>
// kernel: up_pixel_forward.1
= control target key start
LH: loop header
LB: loop body
LE: loop exit
PB: predicated region body
PF: predicated region fallthrough
CT: control target
= control target key end

     0   :  { %s634_s12 = smov 0   ;;  %s636_s13 = smov 0   ;;  %s822_s0 = inlined_call_operand.vmem [shape: f32[64,64], index: 0, kind: input, shape index: {}]   ;;  %s823_s1 = inlined_call_operand.vmem [shape: f32[64,1], index: 1, kind: input, shape index: {}]   ;;  %s824_s2 = inlined_call_operand.vmem [shape: f32[64,512], index: 2, kind: input, shape index: {}]   ;;  %s825_s3 = inlined_call_operand.vmem [shape: f32[64,512], index: 3, kind: output, shape index: {}]  }
   0x1   :  { %s638_s14 = smov 0  }
   0x2 LB: > { %s533_s15 = sadd.s32 4294967295, %s611_s14   ;;  %s651_s16 = sadd.s32 1, %s611_s14   ;;  %s611_s14 = sphi %s638_s14, %s829_s14   ;;  %s607_s13 = sphi %s636_s13, %s828_s13   ;;  %s603_s12 = sphi %s634_s12, %s827_s12  }
   0x3   : > { %s59_s17 = ssub.s32 %s611_s14, %s651_s16  ;;  %s62_s18 = sadd.s32 1, %s607_s13 }
   0x4   : > { %p60_p0 = scmp.eq.s32.totalorder %s59_s17, 0  ;;  %p69_p1 = scmp.ne.s32.totalorder %s607_s13, %s603_s12 }
   0x5   : > { %p70_p2 = scmp.eq.s32.totalorder %s611_s14, 0  ;;  %p99_p3 = scmp.eq.s32.totalorder %s533_s15, 1 }
   0x6   : > { %s662_s19 = scalar_select %p60_p0, %s607_s13, %s62_s18  }
   0x7   : > { %p71_p4 = por %p70_p2, %p69_p1  ;;  %p664_p5 = por %p99_p3, %p69_p1 }
   0x8   : > { %p536_p6 = scmp.ge.s32.totalorder %s611_s14, 2 }
   0xa   : > { %127 = sbr.rel (%p536_p6) target bundleno = 29 (0x1d), region = 24 }
  0x11   : > { %130 = sbr.rel (!%p71_p4) target bundleno = 29 (0x1d), region = 28  ;;  %s132_s21 = sand.u32 (%p71_p4), 1, %s607_s13  }
  0x12   : > { %s552_s22 = sshll.u32 (%p71_p4), %s611_s14, 4  ;;  %s537_s23 = sshll.u32 (%p71_p4), %s132_s21, 7 }
  0x13   : > { %s674_s26 = scalar_lea.vmem (%p71_p4), %s824_s2, %s552_s22  ;;  %s134_s27 = scalar_lea.vmem (%p71_p4), [#allocation2], %s537_s23 }
  0x14   : > { %v150_v0 = vld [vmem:[%s674_s26] sm:$0xff] (%p71_p4)  ;;  %v152_v1 = vld [vmem:[%s674_s26 + $0x8] sm:$0xff] (%p71_p4) }
  0x15   : > { %v154_v2 = vld [vmem:[%s674_s26 + $0x20] sm:$0xff] (%p71_p4)  ;;  %151 = vst [vmem:[%s134_s27] sm:$0xff] (%p71_p4), %v150_v0  ;;  %153 = vst [vmem:[%s134_s27 + $0x8] sm:$0xff] (%p71_p4), %v152_v1  ;;  %v156_v3 = vld [vmem:[%s674_s26 + $0x28] sm:$0xff] (%p71_p4) }
  0x16   : > { %155 = vst [vmem:[%s134_s27 + $0x10] sm:$0xff] (%p71_p4), %v154_v2  ;;  %v158_v4 = vld [vmem:[%s674_s26 + $0x40] sm:$0xff] (%p71_p4)  ;;  %v160_v5 = vld [vmem:[%s674_s26 + $0x48] sm:$0xff] (%p71_p4)  ;;  %157 = vst [vmem:[%s134_s27 + $0x18] sm:$0xff] (%p71_p4), %v156_v3 }
  0x17   : > { %159 = vst [vmem:[%s134_s27 + $0x20] sm:$0xff] (%p71_p4), %v158_v4  ;;  %161 = vst [vmem:[%s134_s27 + $0x28] sm:$0xff] (%p71_p4), %v160_v5  ;;  %v162_v6 = vld [vmem:[%s674_s26 + $0x60] sm:$0xff] (%p71_p4)  ;;  %v164_v7 = vld [vmem:[%s674_s26 + $0x68] sm:$0xff] (%p71_p4) }
  0x18   : > { %v166_v8 = vld [vmem:[%s674_s26 + $0x80] sm:$0xff]  ;;  %163 = vst [vmem:[%s134_s27 + $0x30] sm:$0xff] %v162_v6  ;;  %165 = vst [vmem:[%s134_s27 + $0x38] sm:$0xff] %v164_v7  ;;  %v168_v9 = vld [vmem:[%s674_s26 + $0x88] sm:$0xff] }
  0x19   : > { %167 = vst [vmem:[%s134_s27 + $0x40] sm:$0xff] %v166_v8  ;;  %v170_v10 = vld [vmem:[%s674_s26 + $0xa0] sm:$0xff]  ;;  %v172_v11 = vld [vmem:[%s674_s26 + $0xa8] sm:$0xff]  ;;  %169 = vst [vmem:[%s134_s27 + $0x48] sm:$0xff] %v168_v9 }
  0x1a   : > { %171 = vst [vmem:[%s134_s27 + $0x50] sm:$0xff] %v170_v10  ;;  %173 = vst [vmem:[%s134_s27 + $0x58] sm:$0xff] %v172_v11  ;;  %v174_v12 = vld [vmem:[%s674_s26 + $0xc0] sm:$0xff]  ;;  %v176_v13 = vld [vmem:[%s674_s26 + $0xc8] sm:$0xff] }
  0x1b   : > { %v178_v14 = vld [vmem:[%s674_s26 + $0xe0] sm:$0xff]  ;;  %175 = vst [vmem:[%s134_s27 + $0x60] sm:$0xff] %v174_v12  ;;  %177 = vst [vmem:[%s134_s27 + $0x68] sm:$0xff] %v176_v13  ;;  %v180_v15 = vld [vmem:[%s674_s26 + $0xe8] sm:$0xff] }
  0x1c   : > { %179 = vst [vmem:[%s134_s27 + $0x70] sm:$0xff] %v178_v14  ;;  %181 = vst [vmem:[%s134_s27 + $0x78] sm:$0xff] %v180_v15 }
  0x1d PF: > { %p540_p7 = scmp.ge.s32.totalorder %s611_s14, 1  ;;  %p186_p8 = scmp.lt.s32.totalorder %s611_s14, 3 }
  0x1f   : > { %p187_p9 = pnand %p540_p7, %p186_p8 }
  0x20   : > { %s193_s28 = sand.u32 (!%p187_p9), 1, %s603_s12   ;;  %v613_v16 = vmov (!%p187_p9), 0   ;;  %v256_v17 = vld [vmem:[%s823_s1 + $0x10] sm:$0xff] (!%p187_p9)  ;;  %v254_v35 = vld [vmem:[%s823_s1] sm:$0xff] (!%p187_p9)  ;;  %v257_v36 = vld [vmem:[%s823_s1 + $0x18] sm:$0xff] (!%p187_p9)  ;;  %vm302_vm0 = vcmask (!%p187_p9), 523264  }
  0x21   : > { %190 = sbr.rel (%p187_p9) target bundleno = 291 (0x123), region = 51  ;;  %s695_s29 = sshll.u32 (!%p187_p9), %s193_s28, 7  ;;  %347 = vmatprep.mubr.bf16.mxu0 (!%p187_p9), %v613_v16  ;;  %367 = vmatprep.mubr.bf16.mxu1 (!%p187_p9), %v613_v16  ;;  %v255_v39 = vld [vmem:[%s823_s1 + $0x8] sm:$0xff] (!%p187_p9)  ;;  %v218_v45 = vld [vmem:[%s822_s0] sm:$0xff] (!%p187_p9)  ;;  %v261_v47 = vld [vmem:[%s823_s1 + $0x38] sm:$0xff] (!%p187_p9) }
  0x22   : > { %588 = vset.pattern.permute.xlu1 (!%p187_p9), %v613_v16  ;;  %587 = vset.pattern.permute.xlu0 (!%p187_p9), %v613_v16  ;;  %s705_s5 = scalar_lea.vmem (!%p187_p9), [#allocation2], %s695_s29  ;;  %v259_v40 = vld [vmem:[%s823_s1 + $0x28] sm:$0xff] (!%p187_p9)  ;;  %v258_v46 = vld [vmem:[%s823_s1 + $0x20] sm:$0xff] (!%p187_p9)  ;;  %v260_v54 = vld [vmem:[%s823_s1 + $0x30] sm:$0xff] (!%p187_p9)  ;;  %s771_s22 = scalar_lea.vmem (!%p187_p9), [#allocation3], %s695_s29 }
  0x23   : > { %v231_v18 = vld [vmem:[%s705_s5 + $0x8] sm:$0xff] (!%p187_p9)  ;;  %v233_v19 = vld [vmem:[%s705_s5 + $0x18] sm:$0xff] (!%p187_p9)  ;;  %v230_v20 = vld [vmem:[%s705_s5] sm:$0xff] (!%p187_p9)  ;;  %274 = vperm.xlu1 (!%p187_p9), %588, %v256_v17   ;;  %264 = vperm.xlu0 (!%p187_p9), %587, %v254_v35  }
  0x24   : > { %v247_v21 = vpack.c.bf16 (!%p187_p9), %v233_v19, %v231_v18  ;;  %v232_v22 = vld [vmem:[%s705_s5 + $0x10] sm:$0xff] (!%p187_p9)  ;;  %v235_v23 = vld [vmem:[%s705_s5 + $0x28] sm:$0xff] (!%p187_p9)  ;;  %v237_v24 = vld [vmem:[%s705_s5 + $0x38] sm:$0xff] (!%p187_p9) }
  0x25   : > { %v246_v25 = vpack.c.bf16 (!%p187_p9), %v232_v22, %v230_v20  ;;  %v249_v26 = vpack.c.bf16 (!%p187_p9), %v237_v24, %v235_v23  ;;  %v234_v27 = vld [vmem:[%s705_s5 + $0x20] sm:$0xff] (!%p187_p9)  ;;  %v236_v28 = vld [vmem:[%s705_s5 + $0x30] sm:$0xff] (!%p187_p9)  ;;  %v239_v29 = vld [vmem:[%s705_s5 + $0x48] sm:$0xff] (!%p187_p9) }
  0x26   : > { %315 = vmatprep.subr.bf16.mxu0 (!%p187_p9), %v247_v21  ;;  %554 = vmatprep.subr.bf16.mxu1 (!%p187_p9), %v247_v21  ;;  %v241_v30 = vld [vmem:[%s705_s5 + $0x58] sm:$0xff] (!%p187_p9)  ;;  %v248_v31 = vpack.c.bf16 (!%p187_p9), %v236_v28, %v234_v27  ;;  %v238_v32 = vld [vmem:[%s705_s5 + $0x40] sm:$0xff] (!%p187_p9)  ;;  %v240_v34 = vld [vmem:[%s705_s5 + $0x50] sm:$0xff] (!%p187_p9) }
  0x27   : > { %316 = vmatpush1.bf16.msra.mxu0 (!%p187_p9), %v246_v25  ;;  %558 = vmatpush1.bf16.msra.mxu1 (!%p187_p9), %v246_v25  ;;  %v251_v33 = vpack.c.bf16 (!%p187_p9), %v241_v30, %v239_v29  ;;  %v243_v37 = vld [vmem:[%s705_s5 + $0x68] sm:$0xff] (!%p187_p9)  ;;  %v245_v38 = vld [vmem:[%s705_s5 + $0x78] sm:$0xff] (!%p187_p9)  ;;  %v250_v41 = vpack.c.bf16 (!%p187_p9), %v240_v34, %v238_v32  ;;  %v242_v43 = vld [vmem:[%s705_s5 + $0x60] sm:$0xff] (!%p187_p9) }
  0x28   : > { %317 = vmatprep.subr.bf16.mxu0 %v249_v26  ;;  %555 = vmatprep.subr.bf16.mxu1 %v249_v26  ;;  %v253_v42 = vpack.c.bf16 %v245_v38, %v243_v37  ;;  %v244_v44 = vld [vmem:[%s705_s5 + $0x70] sm:$0xff]  ;;  %v219_v49 = vld [vmem:[%s822_s0 + $0x8] sm:$0xff]  ;;  %v222_v50 = vld [vmem:[%s822_s0 + $0x20] sm:$0xff]  ;;  %s553_s29 = sshll.u32 (%p664_p5), %s533_s15, 4 }
  0x29   : > { %279 = vperm.xlu1 %588, %v257_v36   ;;  %269 = vperm.xlu0 %587, %v255_v39   ;;  %v252_v48 = vpack.c.bf16 %v244_v44, %v242_v43  ;;  %v223_v51 = vld [vmem:[%s822_s0 + $0x28] sm:$0xff]  ;;  %v226_v52 = vpack.c.bf16 %v219_v49, %v218_v45  ;;  %v220_v55 = vld [vmem:[%s822_s0 + $0x10] sm:$0xff]  ;;  %v221_v56 = vld [vmem:[%s822_s0 + $0x18] sm:$0xff]  ;;  %s429_s20 = scalar_lea.vmem (%p664_p5), %s825_s3, %s553_s29 }
  0x2a   : > { %v228_v53 = vpack.c.bf16 %v223_v51, %v222_v50  ;;  %v224_v57 = vld [vmem:[%s822_s0 + $0x30] sm:$0xff]  ;;  %v225_v58 = vld [vmem:[%s822_s0 + $0x38] sm:$0xff]  ;;  %v227_v59 = vpack.c.bf16 %v221_v56, %v220_v55 }
  0x2b   : > { %318 = vmatpush1.bf16.msra.mxu0 %v248_v31  ;;  %559 = vmatpush1.bf16.msra.mxu1 %v248_v31  ;;  %v229_v60 = vpack.c.bf16 %v225_v58, %v224_v57 }
  0x2c   : > { %319 = vmatprep.subr.bf16.mxu0 %v251_v33  ;;  %556 = vmatprep.subr.bf16.mxu1 %v251_v33 }
  0x2d   : > { %289 = vperm.xlu1 %588, %v259_v40   ;;  %284 = vperm.xlu0 %587, %v258_v46  }
  0x2f   : > { %320 = vmatpush1.bf16.msra.mxu0 %v250_v41  ;;  %560 = vmatpush1.bf16.msra.mxu1 %v250_v41 }
  0x30   : > { %321 = vmatprep.subr.bf16.mxu0 %v253_v42  ;;  %557 = vmatprep.subr.bf16.mxu1 %v253_v42 }
  0x31   : > { %299 = vperm.xlu1 %588, %v261_v47   ;;  %294 = vperm.xlu0 %587, %v260_v54  }
  0x33   : > { %322 = vmatpush1.bf16.msra.mxu0 %v252_v48  ;;  %561 = vmatpush1.bf16.msra.mxu1 %v252_v48 }
  0x36   : > { %543 = vmatmul.mubr.msk.bf16.vlgmr.msra.gmra.mrb[0].mxu0 %vm302_vm0, %v226_v52  ;;  %545 = vmatmul.mubr.msk.bf16.vlgmr.msra.gmra.mrb[0].mxu1 %vm302_vm0, %v228_v53 }
  0x37   : > { %357 = vmatprep.mubr.bf16.mxu0 %v613_v16  ;;  %377 = vmatprep.mubr.bf16.mxu1 %v613_v16 }
  0x3e   : > { %544 = vmatmul.mubr.msk.bf16.gmra.mrb[4].mxu0 %vm302_vm0, %v227_v59  ;;  %546 = vmatmul.mubr.msk.bf16.gmra.mrb[4].mxu1 %vm302_vm0, %v229_v60 }
  0xa2   : > { %v275_v61 = vpop.permute.xlu1 %274  ;;  %v265_v62 = vpop.permute.xlu0 %264 }
  0xa8   : > { %v280_v63 = vpop.permute.xlu1 %279  ;;  %v270_v0 = vpop.permute.xlu0 %269 }
  0xac   : > { %v290_v1 = vpop.permute.xlu1 %289  ;;  %v285_v2 = vpop.permute.xlu0 %284 }
  0xb0   : > { %v300_v27 = vpop.permute.xlu1 %299  ;;  %v295_v28 = vpop.permute.xlu0 %294 }
 0x109   : > { %v349_v3 = vpop.f32.mrb[0].mxu0  ;;  %v369_v4 = vpop.f32.mrb[0].mxu1 }
 0x10a   : > { %v350_v5 = vadd.f32 %v349_v3, %v265_v62  ;;  %v370_v6 = vadd.f32 %v369_v4, %v285_v2  ;;  %v351_v7 = vpop.f32.mrb[1].mxu0  ;;  %v371_v8 = vpop.f32.mrb[1].mxu1 }
 0x10b   : > { %v352_v9 = vadd.f32 %v351_v7, %v265_v62  ;;  %v372_v10 = vadd.f32 %v371_v8, %v285_v2  ;;  %v353_v11 = vpop.f32.mrb[2].mxu0  ;;  %v373_v12 = vpop.f32.mrb[2].mxu1 }
 0x10c   : > { %v388_v13 = vmax.f32 %v350_v5, 0.0  ;;  %v396_v14 = vmax.f32 %v370_v6, 0.0  ;;  %v354_v15 = vadd.f32 %v353_v11, %v270_v0  ;;  %v374_v16 = vadd.f32 %v373_v12, %v290_v1  ;;  %v355_v17 = vpop.f32.mrb[3].mxu0  ;;  %v375_v18 = vpop.f32.mrb[3].mxu1 }
 0x10d   : > { %v389_v19 = vmax.f32 %v352_v9, 0.0  ;;  %v397_v20 = vmax.f32 %v372_v10, 0.0  ;;  %v356_v21 = vadd.f32 %v355_v17, %v270_v0  ;;  %v376_v22 = vadd.f32 %v375_v18, %v290_v1 }
 0x10e   : > { %404 = vst [vmem:[%s771_s22] sm:$0xff] %v388_v13  ;;  %412 = vst [vmem:[%s771_s22 + $0x40] sm:$0xff] %v396_v14  ;;  %v390_v23 = vmax.f32 %v354_v15, 0.0  ;;  %v398_v24 = vmax.f32 %v374_v16, 0.0 }
 0x10f   : > { %405 = vst [vmem:[%s771_s22 + $0x8] sm:$0xff] %v389_v19  ;;  %413 = vst [vmem:[%s771_s22 + $0x48] sm:$0xff] %v397_v20  ;;  %v391_v25 = vmax.f32 %v356_v21, 0.0  ;;  %v399_v26 = vmax.f32 %v376_v22, 0.0 }
 0x110   : > { %406 = vst [vmem:[%s771_s22 + $0x10] sm:$0xff] %v390_v23  ;;  %414 = vst [vmem:[%s771_s22 + $0x50] sm:$0xff] %v398_v24 }
 0x111   : > { %407 = vst [vmem:[%s771_s22 + $0x18] sm:$0xff] %v391_v25  ;;  %415 = vst [vmem:[%s771_s22 + $0x58] sm:$0xff] %v399_v26  ;;  %v359_v29 = vpop.f32.mrb[4].mxu0  ;;  %v379_v30 = vpop.f32.mrb[4].mxu1 }
 0x112   : > { %v360_v31 = vadd.f32 %v359_v29, %v275_v61  ;;  %v380_v32 = vadd.f32 %v379_v30, %v295_v28  ;;  %v361_v33 = vpop.f32.mrb[5].mxu0  ;;  %v381_v34 = vpop.f32.mrb[5].mxu1 }
 0x113   : > { %v362_v35 = vadd.f32 %v361_v33, %v275_v61  ;;  %v382_v36 = vadd.f32 %v381_v34, %v295_v28  ;;  %v363_v37 = vpop.f32.mrb[6].mxu0  ;;  %v383_v38 = vpop.f32.mrb[6].mxu1  ;;  %426 = sbr.rel (!%p664_p5) target bundleno = 291 (0x123), region = 59 }
 0x114   : > { %v392_v39 = vmax.f32 %v360_v31, 0.0  ;;  %v400_v40 = vmax.f32 %v380_v32, 0.0  ;;  %v364_v41 = vadd.f32 %v363_v37, %v280_v63  ;;  %v384_v42 = vadd.f32 %v383_v38, %v300_v27  ;;  %v365_v43 = vpop.f32.mrb[7].mxu0  ;;  %v385_v44 = vpop.f32.mrb[7].mxu1 }
 0x115   : > { %v393_v45 = vmax.f32 %v362_v35, 0.0  ;;  %v401_v46 = vmax.f32 %v382_v36, 0.0  ;;  %v366_v47 = vadd.f32 %v365_v43, %v280_v63  ;;  %v386_v48 = vadd.f32 %v385_v44, %v300_v27  ;;  %v442_v53 = vld [vmem:[%s771_s22] sm:$0xff] (%p664_p5) }
 0x116   : > { %408 = vst [vmem:[%s771_s22 + $0x20] sm:$0xff] %v392_v39  ;;  %416 = vst [vmem:[%s771_s22 + $0x60] sm:$0xff] %v400_v40  ;;  %v394_v49 = vmax.f32 %v364_v41, 0.0  ;;  %v402_v50 = vmax.f32 %v384_v42, 0.0  ;;  %v444_v54 = vld [vmem:[%s771_s22 + $0x8] sm:$0xff] (%p664_p5)  ;;  %v458_v61 = vld [vmem:[%s771_s22 + $0x40] sm:$0xff] (%p664_p5) }
 0x117   : > { %409 = vst [vmem:[%s771_s22 + $0x28] sm:$0xff] %v393_v45  ;;  %417 = vst [vmem:[%s771_s22 + $0x68] sm:$0xff] %v401_v46  ;;  %v395_v51 = vmax.f32 %v366_v47, 0.0  ;;  %v403_v52 = vmax.f32 %v386_v48, 0.0  ;;  %v446_v55 = vld [vmem:[%s771_s22 + $0x10] sm:$0xff] (%p664_p5)  ;;  %v460_v62 = vld [vmem:[%s771_s22 + $0x48] sm:$0xff] (%p664_p5) }
 0x118   : > { %410 = vst [vmem:[%s771_s22 + $0x30] sm:$0xff] %v394_v49  ;;  %418 = vst [vmem:[%s771_s22 + $0x70] sm:$0xff] %v402_v50  ;;  %v448_v56 = vld [vmem:[%s771_s22 + $0x18] sm:$0xff] (%p664_p5)  ;;  %v462_v63 = vld [vmem:[%s771_s22 + $0x50] sm:$0xff] (%p664_p5) }
 0x119   : > { %411 = vst [vmem:[%s771_s22 + $0x38] sm:$0xff] %v395_v51  ;;  %419 = vst [vmem:[%s771_s22 + $0x78] sm:$0xff] %v403_v52  ;;  %v464_v0 = vld [vmem:[%s771_s22 + $0x58] sm:$0xff] (%p664_p5) }
 0x11a   : > { %443 = vst [vmem:[%s429_s20] sm:$0xff] %v442_v53  ;;  %445 = vst [vmem:[%s429_s20 + $0x8] sm:$0xff] %v444_v54 }
 0x11b   : > { %447 = vst [vmem:[%s429_s20 + $0x20] sm:$0xff] %v446_v55  ;;  %449 = vst [vmem:[%s429_s20 + $0x28] sm:$0xff] %v448_v56 }
 0x11c   : > { %459 = vst [vmem:[%s429_s20 + $0x80] sm:$0xff] %v458_v61  ;;  %461 = vst [vmem:[%s429_s20 + $0x88] sm:$0xff] %v460_v62 }
 0x11d   : > { %v450_v57 = vld [vmem:[%s771_s22 + $0x20] sm:$0xff]  ;;  %463 = vst [vmem:[%s429_s20 + $0xa0] sm:$0xff] %v462_v63  ;;  %465 = vst [vmem:[%s429_s20 + $0xa8] sm:$0xff] %v464_v0 }
 0x11e   : > { %v452_v58 = vld [vmem:[%s771_s22 + $0x28] sm:$0xff]  ;;  %451 = vst [vmem:[%s429_s20 + $0x40] sm:$0xff] %v450_v57  ;;  %v466_v1 = vld [vmem:[%s771_s22 + $0x60] sm:$0xff] }
 0x11f   : > { %453 = vst [vmem:[%s429_s20 + $0x48] sm:$0xff] %v452_v58  ;;  %v454_v59 = vld [vmem:[%s771_s22 + $0x30] sm:$0xff]  ;;  %v468_v2 = vld [vmem:[%s771_s22 + $0x68] sm:$0xff]  ;;  %467 = vst [vmem:[%s429_s20 + $0xc0] sm:$0xff] %v466_v1 }
 0x120   : > { %v456_v60 = vld [vmem:[%s771_s22 + $0x38] sm:$0xff]  ;;  %455 = vst [vmem:[%s429_s20 + $0x60] sm:$0xff] %v454_v59  ;;  %v470_v3 = vld [vmem:[%s771_s22 + $0x70] sm:$0xff]  ;;  %469 = vst [vmem:[%s429_s20 + $0xc8] sm:$0xff] %v468_v2 }
 0x121   : > { %457 = vst [vmem:[%s429_s20 + $0x68] sm:$0xff] %v456_v60  ;;  %471 = vst [vmem:[%s429_s20 + $0xe0] sm:$0xff] %v470_v3  ;;  %v472_v4 = vld [vmem:[%s771_s22 + $0x78] sm:$0xff] }
 0x122   : > { %473 = vst [vmem:[%s429_s20 + $0xe8] sm:$0xff] %v472_v4 }
 0x123 PF: > { %p10_p10 = scmp.ge.s32.totalorder %s651_s16, 4   ;;  %s827_s12 = smov %s607_s13 }
 0x124   : > { %s828_s13 = smov %s662_s19  ;;  %s829_s14 = smov %s651_s16 }
 0x125   :  { %12 = sbr.rel (!%p10_p10) target bundleno = 2 (0x2), region = 113 }

</bundles_post_ra>
